<compile_context>
chip_gen: v7x
topology: tpu7x:2x2x1
jax: 0.10.0
libtpu: 0.0.40
codegen_flags: <defaults>
</compile_context>

<pallas_src>
import functools

import jax
import jax.numpy as jnp
from jax import lax
from jax.experimental import pallas as pl
from jax.experimental.pallas import tpu as pltpu


def _round_up(n: int, m: int) -> int:
    return ((n + m - 1) // m) * m


def _fused_mlp_kernel(x_ref, w_ref, b_ref, o_ref, *, num_linear: int):
    """x_ref: (batch_pad, in_pad); w_ref: (L, 128, 128); b_ref: (L, 1, 128).

    Layers 0..L-2 are Linear+ReLU, layer L-1 is Linear only (matches nn.Sequential
    built by the PyTorch module). Activation stays in vregs/VMEM throughout.
    """
    h = x_ref[...]

    def layer(i, h):
        w = w_ref[i]                      # load weight right before its dot
        b = b_ref[i]                      # (1, 128) -> broadcasts over batch rows
        y = jnp.dot(h, w, preferred_element_type=jnp.float32) + b
        return jnp.maximum(y, 0.0)

    # Hidden layers (Linear + ReLU), fully unrolled (small static trip count).
    h = lax.fori_loop(0, num_linear - 1, layer, h, unroll=True)

    # Final Linear (no ReLU).
    w = w_ref[num_linear - 1]
    b = b_ref[num_linear - 1]
    h = jnp.dot(h, w, preferred_element_type=jnp.float32) + b

    o_ref[...] = h.astype(o_ref.dtype)


def fused_mlp(x_pad, w_stack, b_stack, *, logical_batch, logical_dims):
    """Single fused pallas_call for the whole MLP; everything lives in VMEM.

    logical_batch / logical_dims are static Python ints used only for the
    advisory CostEstimate (unpadded FLOPs/bytes).
    """
    batch_pad, _ = x_pad.shape
    num_linear, _, out_pad = w_stack.shape

    vmem = pl.BlockSpec(memory_space=pltpu.MemorySpace.VMEM)

    # Advisory cost estimate from LOGICAL (unpadded) dims.
    flops = sum(2 * logical_batch * fi * fo for fi, fo in logical_dims)
    bytes_accessed = (
        logical_batch * logical_dims[0][0] * 4          # x
        + logical_batch * logical_dims[-1][1] * 4       # y
        + sum((fi * fo + fo) * 4 for fi, fo in logical_dims)  # W, b
    )

    return pl.pallas_call(
        functools.partial(_fused_mlp_kernel, num_linear=num_linear),
        out_shape=jax.ShapeDtypeStruct((batch_pad, out_pad), jnp.float32),
        in_specs=[vmem, vmem, vmem],
        out_specs=vmem,
        cost_estimate=pl.CostEstimate(
            flops=flops, transcendentals=0, bytes_accessed=bytes_accessed),
    )(x_pad, w_stack, b_stack)


def init_params(key, input_size, hidden_size, output_size, num_layers):
    """Deterministic init mimicking torch.nn.Linear's U(-1/sqrt(fan_in), +1/sqrt(fan_in))."""
    dims = []
    in_dim = input_size
    for _ in range(num_layers):
        dims.append((in_dim, hidden_size))
        in_dim = hidden_size
    dims.append((in_dim, output_size))

    params = []
    for (fan_in, fan_out) in dims:
        key, kw, kb = jax.random.split(key, 3)
        bound = 1.0 / jnp.sqrt(jnp.float32(fan_in))
        w = jax.random.uniform(kw, (fan_in, fan_out), jnp.float32, -bound, bound)
        b = jax.random.uniform(kb, (1, fan_out), jnp.float32, -bound, bound)
        params.append((w, b))
    return params, dims


def stack_params(params):
    """One-time: zero-pad each (w, b) to (128, 128) / (1, 128) and stack into
    a single (L, 128, 128) weight array and (L, 1, 128) bias array.
    Zero padding passes transparently through bias-add and ReLU."""
    ws, bs = [], []
    for (w, b) in params:
        fi, fo = w.shape
        fi_p, fo_p = _round_up(fi, 128), _round_up(fo, 128)
        assert fi_p == 128 and fo_p == 128, "stacking assumes all dims pad to 128"
        ws.append(jnp.zeros((fi_p, fo_p), jnp.float32).at[:fi, :fo].set(w))
        bs.append(jnp.zeros((1, fo_p), jnp.float32).at[:, :fo].set(b))
    return jnp.stack(ws, axis=0), jnp.stack(bs, axis=0)


def pad_input(x):
    """One-time host-side padding of x to (batch_pad, 128); NOT per forward call."""
    batch, in_dim = x.shape
    batch_pad = _round_up(batch, 8)
    in_pad = _round_up(in_dim, 128)
    return jnp.zeros((batch_pad, in_pad), jnp.float32).at[:batch, :in_dim].set(x)


def make_forward(logical_batch, logical_dims):
    """Jitted forward: padded x in, padded y out (no pad/slice HLOs per call)."""
    dims = tuple(tuple(d) for d in logical_dims)

    @jax.jit
    def forward(x_pad, w_stack, b_stack):
        return fused_mlp(x_pad, w_stack, b_stack,
                         logical_batch=logical_batch, logical_dims=dims)

    return forward


if __name__ == "__main__":
    # Small shapes consistent with the module's forward.
    batch = 4
    input_size = 16
    hidden_size = 32
    output_size = 8
    num_layers = 3

    key = jax.random.PRNGKey(0)
    key, kx = jax.random.split(key)
    x = jax.random.normal(kx, (batch, input_size), jnp.float32)

    params, dims = init_params(key, input_size, hidden_size, output_size, num_layers)

    # One-time setup: stack/pad params and pad the input (kept padded upstream).
    w_stack, b_stack = stack_params(params)
    x_pad = pad_input(x)

    forward = make_forward(batch, dims)
    y_pad = forward(x_pad, w_stack, b_stack)
    y_pad = jax.block_until_ready(y_pad)

    # Downstream consumer takes the logical sub-block of the padded output.
    out = y_pad[:batch, :output_size]

    # Pure-JAX reference (unpadded) for sanity.
    ref = x
    for i, (w, b) in enumerate(params):
        ref = ref @ w + b
        if i < len(params) - 1:
            ref = jnp.maximum(ref, 0.0)

    assert out.shape == (batch, output_size)
    assert jnp.allclose(out, ref, atol=1e-5, rtol=1e-5)

    print("KERNEL_OK")
</pallas_src>

<mosaic_0001>
module attributes {stable_mosaic.version = 11 : i64} {
  func.func @_fused_mlp_kernel(%arg0: memref<8x128xf32, #tpu.memory_space<vmem>>, %arg1: memref<4x128x128xf32, #tpu.memory_space<vmem>>, %arg2: memref<4x1x128xf32, #tpu.memory_space<vmem>>, %arg3: memref<8x128xf32, #tpu.memory_space<vmem>>) attributes {dimension_semantics = [], scalar_prefetch = 0 : i64, scratch_operands = 0 : i64, tpu.core_type = #tpu.core_type<tc>} {
    %c0 = arith.constant 0 : index
    %c0_0 = arith.constant 0 : index
    %0 = vector.load %arg0[%c0, %c0_0] : memref<8x128xf32, #tpu.memory_space<vmem>>, vector<8x128xf32>
    %c0_i32 = arith.constant 0 : i32
    %1 = arith.index_cast %c0_i32 : i32 to index
    %c0_1 = arith.constant 0 : index
    %c0_2 = arith.constant 0 : index
    %2 = vector.load %arg1[%1, %c0_1, %c0_2] : memref<4x128x128xf32, #tpu.memory_space<vmem>>, vector<1x128x128xf32>
    %3 = vector.shape_cast %2 : vector<1x128x128xf32> to vector<128x128xf32>
    %4 = arith.index_cast %c0_i32 : i32 to index
    %c0_3 = arith.constant 0 : index
    %c0_4 = arith.constant 0 : index
    %5 = vector.load %arg2[%4, %c0_3, %c0_4] : memref<4x1x128xf32, #tpu.memory_space<vmem>>, vector<1x1x128xf32>
    %6 = vector.shape_cast %5 : vector<1x1x128xf32> to vector<1x128xf32>
    %cst = arith.constant dense<0.000000e+00> : vector<8x128xf32>
    %7 = tpu.matmul %0, %3, %cst {dimension_numbers = #tpu.dot_dimension_numbers<[1], [0], [0], [1], [0, 0, 1, 1], [], []>} : vector<8x128xf32>, vector<128x128xf32>, vector<8x128xf32> -> vector<8x128xf32>
    %8 = vector.broadcast %6 : vector<1x128xf32> to vector<8x128xf32>
    %9 = arith.addf %7, %8 : vector<8x128xf32>
    %cst_5 = arith.constant 0.000000e+00 : f32
    %10 = vector.broadcast %cst_5 : f32 to vector<8x128xf32>
    %11 = arith.maximumf %9, %10 : vector<8x128xf32>
    %c1_i32 = arith.constant 1 : i32
    %12 = arith.index_cast %c1_i32 : i32 to index
    %c0_6 = arith.constant 0 : index
    %c0_7 = arith.constant 0 : index
    %13 = vector.load %arg1[%12, %c0_6, %c0_7] : memref<4x128x128xf32, #tpu.memory_space<vmem>>, vector<1x128x128xf32>
    %14 = vector.shape_cast %13 : vector<1x128x128xf32> to vector<128x128xf32>
    %15 = arith.index_cast %c1_i32 : i32 to index
    %c0_8 = arith.constant 0 : index
    %c0_9 = arith.constant 0 : index
    %16 = vector.load %arg2[%15, %c0_8, %c0_9] : memref<4x1x128xf32, #tpu.memory_space<vmem>>, vector<1x1x128xf32>
    %17 = vector.shape_cast %16 : vector<1x1x128xf32> to vector<1x128xf32>
    %cst_10 = arith.constant dense<0.000000e+00> : vector<8x128xf32>
    %18 = tpu.matmul %11, %14, %cst_10 {dimension_numbers = #tpu.dot_dimension_numbers<[1], [0], [0], [1], [0, 0, 1, 1], [], []>} : vector<8x128xf32>, vector<128x128xf32>, vector<8x128xf32> -> vector<8x128xf32>
    %19 = vector.broadcast %17 : vector<1x128xf32> to vector<8x128xf32>
    %20 = arith.addf %18, %19 : vector<8x128xf32>
    %cst_11 = arith.constant 0.000000e+00 : f32
    %21 = vector.broadcast %cst_11 : f32 to vector<8x128xf32>
    %22 = arith.maximumf %20, %21 : vector<8x128xf32>
    %c2_i32 = arith.constant 2 : i32
    %23 = arith.index_cast %c2_i32 : i32 to index
    %c0_12 = arith.constant 0 : index
    %c0_13 = arith.constant 0 : index
    %24 = vector.load %arg1[%23, %c0_12, %c0_13] : memref<4x128x128xf32, #tpu.memory_space<vmem>>, vector<1x128x128xf32>
    %25 = vector.shape_cast %24 : vector<1x128x128xf32> to vector<128x128xf32>
    %26 = arith.index_cast %c2_i32 : i32 to index
    %c0_14 = arith.constant 0 : index
    %c0_15 = arith.constant 0 : index
    %27 = vector.load %arg2[%26, %c0_14, %c0_15] : memref<4x1x128xf32, #tpu.memory_space<vmem>>, vector<1x1x128xf32>
    %28 = vector.shape_cast %27 : vector<1x1x128xf32> to vector<1x128xf32>
    %cst_16 = arith.constant dense<0.000000e+00> : vector<8x128xf32>
    %29 = tpu.matmul %22, %25, %cst_16 {dimension_numbers = #tpu.dot_dimension_numbers<[1], [0], [0], [1], [0, 0, 1, 1], [], []>} : vector<8x128xf32>, vector<128x128xf32>, vector<8x128xf32> -> vector<8x128xf32>
    %30 = vector.broadcast %28 : vector<1x128xf32> to vector<8x128xf32>
    %31 = arith.addf %29, %30 : vector<8x128xf32>
    %cst_17 = arith.constant 0.000000e+00 : f32
    %32 = vector.broadcast %cst_17 : f32 to vector<8x128xf32>
    %33 = arith.maximumf %31, %32 : vector<8x128xf32>
    %c3_i32 = arith.constant 3 : i32
    %c3 = arith.constant 3 : index
    %c0_18 = arith.constant 0 : index
    %c0_19 = arith.constant 0 : index
    %34 = vector.load %arg1[%c3, %c0_18, %c0_19] : memref<4x128x128xf32, #tpu.memory_space<vmem>>, vector<1x128x128xf32>
    %35 = vector.shape_cast %34 : vector<1x128x128xf32> to vector<128x128xf32>
    %c3_20 = arith.constant 3 : index
    %c0_21 = arith.constant 0 : index
    %c0_22 = arith.constant 0 : index
    %36 = vector.load %arg2[%c3_20, %c0_21, %c0_22] : memref<4x1x128xf32, #tpu.memory_space<vmem>>, vector<1x1x128xf32>
    %37 = vector.shape_cast %36 : vector<1x1x128xf32> to vector<1x128xf32>
    %cst_23 = arith.constant dense<0.000000e+00> : vector<8x128xf32>
    %38 = tpu.matmul %33, %35, %cst_23 {dimension_numbers = #tpu.dot_dimension_numbers<[1], [0], [0], [1], [0, 0, 1, 1], [], []>} : vector<8x128xf32>, vector<128x128xf32>, vector<8x128xf32> -> vector<8x128xf32>
    %39 = vector.broadcast %37 : vector<1x128xf32> to vector<8x128xf32>
    %40 = arith.addf %38, %39 : vector<8x128xf32>
    %c0_24 = arith.constant 0 : index
    %c0_25 = arith.constant 0 : index
    %41 = vector.load %arg3[%c0_24, %c0_25] : memref<8x128xf32, #tpu.memory_space<vmem>>, vector<8x128xf32>
    tpu.vector_store %arg3[%c0_24, %c0_25], %40 {strides = array<i32>} : memref<8x128xf32, #tpu.memory_space<vmem>>, vector<8x128xf32>,
    return
  }
}

</mosaic_0001>

<bundles_post_ra>
// kernel: forward.1
= control target key start
LH: loop header
LB: loop body
LE: loop exit
PB: predicated region body
PF: predicated region fallthrough
CT: control target
= control target key end

     0   :  { %8 = vsyncpa [#allocation3], 0  ;;  %s954_s0 = inlined_call_operand.hbm [shape: f32[8,128], index: 0, kind: input, shape index: {}]   ;;  %s955_s1 = inlined_call_operand.hbm [shape: f32[4,128,128], index: 1, kind: input, shape index: {}]   ;;  %s956_s2 = inlined_call_operand.vmem [shape: f32[4,1,128], index: 2, kind: input, shape index: {}]   ;;  %s957_s3 = inlined_call_operand.hbm [shape: f32[8,128], index: 3, kind: output, shape index: {}]  }
   0x1   :  { %9 = vsyncpa [#allocation6], 0 }
   0x2   :  { %10 = vsyncpa [#allocation4], 0  ;;  %s831_s12 = smov [#allocation2]   ;;  %s832_s14 = smov [#allocation5]  }
   0x3   :  { %s17_s13 = sshll.u32 %s831_s12, 4  ;;  %s26_s15 = sshll.u32 %s832_s14, 4  ;;  %s18_s13 = int_to_ptr.vmem [resolvable:$true] %s17_s13  ;;  %s859_s15 = int_to_ptr.vmem [resolvable:$true] %s26_s15 }
   0x4   :  { %s759_s18 = scalar_lea.hbm %s954_s0, 128 }
   0x5   :  { %p760_p0 = scmp.ne.s32.totalorder %s954_s0, %s759_s18  ;;  %p763_p1 = scmp.lt.u32.totalorder %s759_s18, %s954_s0 }
   0x7   :  { %p765_p2 = pnand %p763_p1, %p760_p0 }
   0x9   :  { %768 = shalt.err (!%p765_p2)
}
   0xa   :  { %s769_s23 = scalar_lea.vmem %s18_s13, 128  ;;  %p774_p4 = scmp.lt.s32.totalorder %s18_s13, %s18_s13 }
   0xb   :  { %p770_p3 = scmp.ne.s32.totalorder %s18_s13, %s769_s23  ;;  %p775_p5 = scmp.lt.s32.totalorder %s769_s23, %s769_s23 }
   0xd   :  { %p776_p6 = por %p775_p5, %p774_p4 }
   0xf   :  { %p777_p7 = pnand %p776_p6, %p770_p3 }
  0x11   :  { %780 = shalt.err (!%p777_p7)
}
  0x12   :  { %20 = dma.hbm_to_vmem [thread:$0]  %s954_s0, 128, %s18_s13, [#allocation3]  }
  0x13   :  { %s781_s28 = scalar_lea.hbm %s955_s1, 8192 }
  0x14   :  { %p782_p8 = scmp.ne.s32.totalorder %s955_s1, %s781_s28  ;;  %p785_p9 = scmp.lt.u32.totalorder %s781_s28, %s955_s1 }
  0x16   :  { %p787_p10 = pnand %p785_p9, %p782_p8 }
  0x18   :  { %790 = shalt.err (!%p787_p10)
}
  0x19   :  { %s791_s6 = scalar_lea.vmem %s859_s15, 8192  ;;  %p796_p12 = scmp.lt.s32.totalorder %s859_s15, %s859_s15 }
  0x1a   :  { %p792_p11 = scmp.ne.s32.totalorder %s859_s15, %s791_s6  ;;  %p797_p13 = scmp.lt.s32.totalorder %s791_s6, %s791_s6 }
  0x1c   :  { %p798_p0 = por %p797_p13, %p796_p12 }
  0x1e   :  { %p799_p1 = pnand %p798_p0, %p792_p11 }
  0x20   :  { %802 = shalt.err (!%p799_p1)
}
  0x21   :  { %s833_s0 = smov 128   ;;  %s834_s7 = smov 8  }
  0x22   :  { %32 = dma.hbm_to_vmem [thread:$0]  %s955_s1, 8192, %s859_s15, [#allocation6], %s833_s0, %s833_s0, %s834_s7  }
  0x23   :  { %825 = dma.done.wait [#allocation3], 128  }
  0x24   :  { %826 = vsyncadd [#allocation3], 4294967168 }
  0x25   :  { %827 = dma.done.wait [#allocation6], 8192  }
  0x26   :  { %828 = vsyncadd [#allocation6], 4294959104  ;;  %v835_v0 = vmov 0.0|0.0   ;;  %vm836_vm0 = vmmov 0   ;;  %v837_v1 = vmov 0.0   ;;  %v42_v2 = vld [vmem:[#allocation5] sm:$0xff] }
  0x27   :  { %655 = vmatprep.subr.bf16.mxu0 %v835_v0  ;;  %547 = vmatprep.mubr.msk.f32.mxu0 %vm836_vm0, %v837_v1  ;;  %v43_v3 = vld [vmem:[#allocation5 + $0x8] sm:$0xff]  ;;  %v44_v4 = vld [vmem:[#allocation5 + $0x10] sm:$0xff]  ;;  %v45_v6 = vld [vmem:[#allocation5 + $0x18] sm:$0xff]  ;;  %s838_s17 = smov [#allocation7]  }
  0x28   :  { %679 = vmatprep.subr.bf16.mxu1 %v835_v0  ;;  %582 = vmatprep.mubr.msk.f32.mxu1 %vm836_vm0, %v837_v1  ;;  %v656_v5 = vpack.c.bf16 %v43_v3, %v42_v2  ;;  %v659_v7 = vpack.c.bf16 %v45_v6, %v44_v4  ;;  %v46_v8 = vld [vmem:[#allocation5 + $0x20] sm:$0xff]  ;;  %v47_v9 = vld [vmem:[#allocation5 + $0x28] sm:$0xff]  ;;  %v139_v12 = vld [vmem:[#allocation5 + $0x90] sm:$0xff]  ;;  %s430_s18 = sshll.u32 %s838_s17, 4  ;;  %s431_s18 = int_to_ptr.vmem [resolvable:$true] %s430_s18 }
  0x29   :  { %v137_v10 = vld [vmem:[#allocation5 + $0x80] sm:$0xff]  ;;  %v138_v11 = vld [vmem:[#allocation5 + $0x88] sm:$0xff]  ;;  %v140_v13 = vld [vmem:[#allocation5 + $0x98] sm:$0xff]  ;;  %v662_v14 = vpack.c.bf16 %v47_v9, %v46_v8  ;;  %s803_s19 = scalar_lea.vmem %s431_s18, 128  ;;  %p808_p3 = scmp.lt.s32.totalorder %s431_s18, %s431_s18 }
  0x2a   :  { %657 = vmatpush3.bf16.msra.mxu0 %v656_v5  ;;  %v680_v15 = vpack.c.bf16 %v138_v11, %v137_v10  ;;  %v48_v16 = vld [vmem:[#allocation5 + $0x30] sm:$0xff]  ;;  %v49_v17 = vld [vmem:[#allocation5 + $0x38] sm:$0xff]  ;;  %v683_v18 = vpack.c.bf16 %v140_v13, %v139_v12  ;;  %v141_v19 = vld [vmem:[#allocation5 + $0xa0] sm:$0xff]  ;;  %p804_p2 = scmp.ne.s32.totalorder %s431_s18, %s803_s19  ;;  %p809_p4 = scmp.lt.s32.totalorder %s803_s19, %s803_s19 }
  0x2b   :  { %658 = vmatprep.subr.bf16.mxu0 %v835_v0  ;;  %v142_v20 = vld [vmem:[#allocation5 + $0xa8] sm:$0xff]  ;;  %v665_v21 = vpack.c.bf16 %v49_v17, %v48_v16  ;;  %v50_v22 = vld [vmem:[#allocation5 + $0x40] sm:$0xff]  ;;  %v143_v25 = vld [vmem:[#allocation5 + $0xb0] sm:$0xff] }
  0x2c   :  { %681 = vmatpush3.bf16.msra.mxu1 %v680_v15  ;;  %v51_v23 = vld [vmem:[#allocation5 + $0x48] sm:$0xff]  ;;  %v686_v24 = vpack.c.bf16 %v142_v20, %v141_v19  ;;  %v144_v26 = vld [vmem:[#allocation5 + $0xb8] sm:$0xff]  ;;  %v52_v28 = vld [vmem:[#allocation5 + $0x50] sm:$0xff]  ;;  %p810_p5 = por %p809_p4, %p808_p3 }
  0x2d   :  { %682 = vmatprep.subr.bf16.mxu1 %v835_v0  ;;  %v668_v27 = vpack.c.bf16 %v51_v23, %v50_v22  ;;  %v53_v29 = vld [vmem:[#allocation5 + $0x58] sm:$0xff]  ;;  %v689_v30 = vpack.c.bf16 %v144_v26, %v143_v25  ;;  %v145_v31 = vld [vmem:[#allocation5 + $0xc0] sm:$0xff]  ;;  %v146_v32 = vld [vmem:[#allocation5 + $0xc8] sm:$0xff] }
  0x2e   :  { %660 = vmatpush3.bf16.msra.mxu0 %v659_v7  ;;  %v671_v33 = vpack.c.bf16 %v53_v29, %v52_v28  ;;  %v54_v34 = vld [vmem:[#allocation5 + $0x60] sm:$0xff]  ;;  %v55_v35 = vld [vmem:[#allocation5 + $0x68] sm:$0xff]  ;;  %v692_v36 = vpack.c.bf16 %v146_v32, %v145_v31  ;;  %v147_v37 = vld [vmem:[#allocation5 + $0xd0] sm:$0xff]  ;;  %p811_p6 = pnand %p810_p5, %p804_p2 }
  0x2f   :  { %661 = vmatprep.subr.bf16.mxu0 %v835_v0  ;;  %v148_v38 = vld [vmem:[#allocation5 + $0xd8] sm:$0xff]  ;;  %v674_v39 = vpack.c.bf16 %v55_v35, %v54_v34  ;;  %v56_v40 = vld [vmem:[#allocation5 + $0x70] sm:$0xff]  ;;  %v149_v43 = vld [vmem:[#allocation5 + $0xe0] sm:$0xff] }
  0x30   :  { %684 = vmatpush3.bf16.msra.mxu1 %v683_v18  ;;  %v57_v41 = vld [vmem:[#allocation5 + $0x78] sm:$0xff]  ;;  %v695_v42 = vpack.c.bf16 %v148_v38, %v147_v37  ;;  %v150_v44 = vld [vmem:[#allocation5 + $0xe8] sm:$0xff]  ;;  %v151_v48 = vld [vmem:[#allocation5 + $0xf0] sm:$0xff] }
  0x31   :  { %685 = vmatprep.subr.bf16.mxu1 %v835_v0  ;;  %v677_v45 = vpack.c.bf16 %v57_v41, %v56_v40  ;;  %v698_v46 = vpack.c.bf16 %v150_v44, %v149_v43  ;;  %v41_v47 = vld [vmem:[#allocation2] sm:$0xff]  ;;  %v233_v51 = vld [vmem:[#allocation5 + $0x100] sm:$0xff]  ;;  %v234_v52 = vld [vmem:[#allocation5 + $0x108] sm:$0xff] }
  0x32   :  { %663 = vmatpush3.bf16.msra.mxu0 %v662_v14  ;;  %v152_v49 = vld [vmem:[#allocation5 + $0xf8] sm:$0xff]  ;;  %v235_v53 = vld [vmem:[#allocation5 + $0x110] sm:$0xff]  ;;  %v704_v54 = vpack.c.bf16 %v234_v52, %v233_v51  ;;  %v237_v57 = vld [vmem:[#allocation5 + $0x120] sm:$0xff] }
  0x33   :  { %664 = vmatprep.subr.bf16.mxu0 %v835_v0  ;;  %v701_v50 = vpack.c.bf16 %v152_v49, %v151_v48  ;;  %v236_v55 = vld [vmem:[#allocation5 + $0x118] sm:$0xff]  ;;  %v238_v58 = vld [vmem:[#allocation5 + $0x128] sm:$0xff]  ;;  %v239_v60 = vld [vmem:[#allocation5 + $0x130] sm:$0xff] }
  0x34   :  { %687 = vmatpush3.bf16.msra.mxu1 %v686_v24  ;;  %v707_v56 = vpack.c.bf16 %v236_v55, %v235_v53  ;;  %v710_v59 = vpack.c.bf16 %v238_v58, %v237_v57  ;;  %v240_v61 = vld [vmem:[#allocation5 + $0x138] sm:$0xff]  ;;  %v241_v63 = vld [vmem:[#allocation5 + $0x140] sm:$0xff]  ;;  %v242_v2 = vld [vmem:[#allocation5 + $0x148] sm:$0xff] }
  0x35   :  { %688 = vmatprep.subr.bf16.mxu1 %v835_v0  ;;  %v713_v62 = vpack.c.bf16 %v240_v61, %v239_v60  ;;  %v716_v3 = vpack.c.bf16 %v242_v2, %v241_v63  ;;  %v243_v4 = vld [vmem:[#allocation5 + $0x150] sm:$0xff]  ;;  %v244_v5 = vld [vmem:[#allocation5 + $0x158] sm:$0xff]  ;;  %v245_v7 = vld [vmem:[#allocation5 + $0x160] sm:$0xff] }
  0x36   :  { %666 = vmatpush3.bf16.msra.mxu0 %v665_v21  ;;  %v719_v6 = vpack.c.bf16 %v244_v5, %v243_v4  ;;  %v246_v8 = vld [vmem:[#allocation5 + $0x168] sm:$0xff]  ;;  %v440_v10 = vld [vmem:[%s956_s2] ss:$0 sm:$0xff]  ;;  %v247_v15 = vld [vmem:[#allocation5 + $0x170] sm:$0xff] }
  0x37   :  { %667 = vmatprep.subr.bf16.mxu0 %v835_v0  ;;  %v722_v9 = vpack.c.bf16 %v246_v8, %v245_v7  ;;  %v248_v16 = vld [vmem:[#allocation5 + $0x178] sm:$0xff]  ;;  %v329_v18 = vld [vmem:[#allocation5 + $0x180] sm:$0xff]  ;;  %v330_v19 = vld [vmem:[#allocation5 + $0x188] sm:$0xff] }
  0x38   :  { %690 = vmatpush3.bf16.msra.mxu1 %v689_v30  ;;  %v725_v17 = vpack.c.bf16 %v248_v16, %v247_v15  ;;  %v331_v20 = vld [vmem:[#allocation5 + $0x190] sm:$0xff]  ;;  %v728_v21 = vpack.c.bf16 %v330_v19, %v329_v18  ;;  %v332_v22 = vld [vmem:[#allocation5 + $0x198] sm:$0xff]  ;;  %v333_v24 = vld [vmem:[#allocation5 + $0x1a0] sm:$0xff] }
  0x39   :  { %691 = vmatprep.subr.bf16.mxu1 %v835_v0  ;;  %v731_v23 = vpack.c.bf16 %v332_v22, %v331_v20  ;;  %v334_v25 = vld [vmem:[#allocation5 + $0x1a8] sm:$0xff]  ;;  %v337_v29 = vld [vmem:[#allocation5 + $0x1c0] sm:$0xff]  ;;  %v339_v32 = vld [vmem:[#allocation5 + $0x1d0] sm:$0xff] }
  0x3a   :  { %669 = vmatpush3.bf16.msra.mxu0 %v668_v27  ;;  %v734_v26 = vpack.c.bf16 %v334_v25, %v333_v24  ;;  %v336_v27 = vld [vmem:[#allocation5 + $0x1b8] sm:$0xff]  ;;  %v338_v30 = vld [vmem:[#allocation5 + $0x1c8] sm:$0xff]  ;;  %v341_v35 = vld [vmem:[#allocation5 + $0x1e0] sm:$0xff] }
  0x3b   :  { %670 = vmatprep.subr.bf16.mxu0 %v835_v0  ;;  %v740_v31 = vpack.c.bf16 %v338_v30, %v337_v29  ;;  %v442_v38 = vld [vmem:[%s956_s2 + $0x1] ss:$0 sm:$0xff]  ;;  %v343_v43 = vld [vmem:[#allocation5 + $0x1f0] sm:$0xff] }
  0x3c   :  { %693 = vmatpush3.bf16.msra.mxu1 %v692_v36  ;;  %v342_v36 = vld [vmem:[#allocation5 + $0x1e8] sm:$0xff]  ;;  %v344_v44 = vld [vmem:[#allocation5 + $0x1f8] sm:$0xff] }
  0x3d   :  { %694 = vmatprep.subr.bf16.mxu1 %v835_v0  ;;  %v746_v37 = vpack.c.bf16 %v342_v36, %v341_v35 }
  0x3e   :  { %672 = vmatpush3.bf16.msra.mxu0 %v671_v33  ;;  %v340_v33 = vld [vmem:[#allocation5 + $0x1d8] sm:$0xff] }
  0x3f   :  { %673 = vmatprep.subr.bf16.mxu0 %v835_v0  ;;  %v743_v34 = vpack.c.bf16 %v340_v33, %v339_v32 }
  0x40   :  { %696 = vmatpush3.bf16.msra.mxu1 %v695_v42 }
  0x41   :  { %697 = vmatprep.subr.bf16.mxu1 %v835_v0 }
  0x42   :  { %675 = vmatpush3.bf16.msra.mxu0 %v674_v39 }
  0x43   :  { %676 = vmatprep.subr.bf16.mxu0 %v835_v0 }
  0x44   :  { %699 = vmatpush3.bf16.msra.mxu1 %v698_v46  ;;  %v444_v46 = vld [vmem:[%s956_s2 + $0x2] ss:$0 sm:$0xff] }
  0x45   :  { %700 = vmatprep.subr.bf16.mxu1 %v835_v0 }
  0x46   :  { %678 = vmatpush3.bf16.msra.mxu0 %v677_v45  ;;  %v749_v45 = vpack.c.bf16 %v344_v44, %v343_v43 }
  0x47   :  { %703 = vmatprep.subr.bf16.mxu0 %v835_v0 }
  0x48   :  { %702 = vmatpush3.bf16.msra.mxu1 %v701_v50  ;;  %v446_v50 = vld [vmem:[%s956_s2 + $0x3] ss:$0 sm:$0xff] }
  0x49   :  { %548 = vmatmul.mubr.f32.vlgmr.msra.gmra.mrb[0].mxu0 %v41_v47  ;;  %727 = vmatprep.subr.bf16.mxu1 %v835_v0 }
  0x4a   :  { %617 = vmatprep.mubr.msk.f32.mxu0 %vm836_vm0, %v837_v1  ;;  %705 = vmatpush3.bf16.msra.mxu0 %v704_v54 }
  0x4b   :  { %706 = vmatprep.subr.bf16.mxu0 %v835_v0 }
  0x4e   :  { %708 = vmatpush3.bf16.msra.mxu0 %v707_v56 }
  0x4f   :  { %709 = vmatprep.subr.bf16.mxu0 %v835_v0 }
  0x52   :  { %711 = vmatpush3.bf16.msra.mxu0 %v710_v59 }
  0x53   :  { %712 = vmatprep.subr.bf16.mxu0 %v835_v0 }
  0x56   :  { %714 = vmatpush3.bf16.msra.mxu0 %v713_v62 }
  0x57   :  { %715 = vmatprep.subr.bf16.mxu0 %v835_v0 }
  0x5a   :  { %717 = vmatpush3.bf16.msra.mxu0 %v716_v3 }
  0x5b   :  { %718 = vmatprep.subr.bf16.mxu0 %v835_v0 }
  0x5e   :  { %720 = vmatpush3.bf16.msra.mxu0 %v719_v6 }
  0x5f   :  { %721 = vmatprep.subr.bf16.mxu0 %v835_v0 }
  0x62   :  { %723 = vmatpush3.bf16.msra.mxu0 %v722_v9 }
  0x63   :  { %724 = vmatprep.subr.bf16.mxu0 %v835_v0 }
  0x66   :  { %726 = vmatpush3.bf16.msra.mxu0 %v725_v17 }
 0x11c   :  { %v131_v11 = vpop.f32.mrb[0].mxu0 }
 0x11d   :  { %v132_v12 = vadd.f32 %v440_v10, %v131_v11  ;;  %v549_v13 = vpop.f32.mrb[1].mxu0 }
 0x11f   :  { %v135_v14 = vmax.f32 %v132_v12, 0.0 }
 0x121   :  { %583 = vmatmul.mubr.f32.vlgmr.msra.gmra.mrb[0].mxu1 %v135_v14 }
 0x122   :  { %652 = vmatprep.mubr.msk.f32.mxu1 %vm836_vm0, %v837_v1  ;;  %729 = vmatpush3.bf16.msra.mxu1 %v728_v21  ;;  %v335_v1 = vld [vmem:[#allocation5 + $0x1b0] sm:$0xff] }
 0x123   :  { %730 = vmatprep.subr.bf16.mxu1 %v835_v0  ;;  %v737_v28 = vpack.c.bf16 %v336_v27, %v335_v1 }
 0x126   :  { %732 = vmatpush3.bf16.msra.mxu1 %v731_v23 }
 0x127   :  { %733 = vmatprep.subr.bf16.mxu1 %v835_v0 }
 0x12a   :  { %735 = vmatpush3.bf16.msra.mxu1 %v734_v26 }
 0x12b   :  { %736 = vmatprep.subr.bf16.mxu1 %v835_v0 }
 0x12e   :  { %738 = vmatpush3.bf16.msra.mxu1 %v737_v28 }
 0x12f   :  { %739 = vmatprep.subr.bf16.mxu1 %v835_v0 }
 0x132   :  { %741 = vmatpush3.bf16.msra.mxu1 %v740_v31 }
 0x133   :  { %742 = vmatprep.subr.bf16.mxu1 %v835_v0 }
 0x136   :  { %744 = vmatpush3.bf16.msra.mxu1 %v743_v34 }
 0x137   :  { %745 = vmatprep.subr.bf16.mxu1 %v835_v0 }
 0x13a   :  { %747 = vmatpush3.bf16.msra.mxu1 %v746_v37 }
 0x13b   :  { %748 = vmatprep.subr.bf16.mxu1 %v835_v0 }
 0x13e   :  { %750 = vmatpush3.bf16.msra.mxu1 %v749_v45 }
 0x1f4   :  { %v227_v39 = vpop.f32.mrb[0].mxu1 }
 0x1f5   :  { %v228_v40 = vadd.f32 %v442_v38, %v227_v39  ;;  %v584_v41 = vpop.f32.mrb[1].mxu1 }
 0x1f7   :  { %v231_v42 = vmax.f32 %v228_v40, 0.0 }
 0x1f9   :  { %618 = vmatmul.mubr.f32.vlgmr.msra.gmra.mrb[2].mxu0 %v231_v42 }
 0x2cc   :  { %v323_v47 = vpop.f32.mrb[2].mxu0 }
 0x2cd   :  { %v324_v48 = vadd.f32 %v444_v46, %v323_v47  ;;  %v619_v0 = vpop.f32.mrb[3].mxu0 }
 0x2cf   :  { %v327_v49 = vmax.f32 %v324_v48, 0.0 }
 0x2d1   :  { %653 = vmatmul.mubr.f32.vlgmr.msra.gmra.mrb[2].mxu1 %v327_v49 }
 0x3a4   :  { %v419_v51 = vpop.f32.mrb[2].mxu1 }
 0x3a5   :  { %v420_v52 = vadd.f32 %v446_v50, %v419_v51  ;;  %v654_v53 = vpop.f32.mrb[3].mxu1 }
 0x3a7   :  { %423 = vst [vmem:[#allocation7] sm:$0xff] %v420_v52 }
 0x3a8   :  { %814 = shalt.err (!%p811_p6)
}
 0x3a9   :  { %s815_s22 = scalar_lea.hbm %s957_s3, 128 }
 0x3aa   :  { %p816_p7 = scmp.ne.s32.totalorder %s957_s3, %s815_s22  ;;  %p819_p8 = scmp.lt.u32.totalorder %s815_s22, %s957_s3 }
 0x3ac   :  { %p821_p9 = pnand %p819_p8, %p816_p7 }
 0x3ae   :  { %824 = shalt.err (!%p821_p9)
}
 0x3af   :  { %433 = dma.vmem_to_hbm [thread:$0]  %s431_s18, 128, %s957_s3, [#allocation4]  }
 0x3b0   :  { %829 = dma.done.wait [#allocation4], 128  }
 0x3b1   :  { %830 = vsyncadd [#allocation4], 4294967168 }
 0x3b2   :  { %437 = vsyncpa [#allocation3], 1 }
 0x3b3   :  { %438 = vsyncpa [#allocation6], 1 }
 0x3b4   :  { %439 = vsyncpa [#allocation4], 1 }

</bundles_post_ra>
